<compile_context>
chip_gen: v6e
topology: v6e:2x2x1
jax: 0.10.0
libtpu: 0.0.40
codegen_flags: <defaults>
</compile_context>

<pallas_src>
import numpy as np

import jax
import jax.numpy as jnp
from jax.experimental import pallas as pl
from jax.experimental.pallas import tpu as pltpu


def _round_up(x: int, m: int) -> int:
    return ((x + m - 1) // m) * m


def _patch_embed_kernel(xp_ref, w_ref, b_ref, o_ref):
    # xp_ref: (tm, K)      compute-dtype patch tile (streamed over the grid)
    # w_ref : (K, E_pad)   compute-dtype flattened conv weight (VMEM-resident)
    # b_ref : (1, E_pad)   f32 bias (VMEM-resident)
    # o_ref : (tm, E_pad)  compute-dtype output tile
    acc = jnp.dot(xp_ref[...], w_ref[...], preferred_element_type=jnp.float32)
    o_ref[...] = (acc + b_ref[...]).astype(o_ref.dtype)


def patch_embed_forward(x, weight, bias, patch_size, *,
                        compute_dtype=jnp.bfloat16,
                        out_dtype=None,
                        return_tokens=False):
    """ViT patch embedding (Conv2d with kernel_size == stride == patch_size).

    x: (B, C, H, W) NCHW.  weight: (E, C, P, P) OIHW.  bias: (E,).

    Returns (B, E, H//P, W//P) by default (matches nn.Conv2d / the module);
    with return_tokens=True returns (B, (H//P)*(W//P), E) tokens and skips the
    (HBM-expensive) NCHW transpose.

    compute_dtype=bfloat16 uses the MXU fast path with f32 accumulation; pass
    compute_dtype=jnp.float32 for exact f32-conv parity.
    """
    B, C, H, W = x.shape
    E = weight.shape[0]
    P = patch_size
    if H % P != 0 or W % P != 0:
        raise ValueError(f"H={H}, W={W} must be divisible by patch_size={P}")
    nH, nW = H // P, W // P
    M = B * nH * nW
    K = C * P * P

    if out_dtype is None:
        out_dtype = x.dtype

    # Lane-dense output width (no-op for real ViT sizes, E = 768/1024/...).
    E_pad = _round_up(E, 128)
    # M tile: 1024 rows when M is large (fits every generation's scoped-VMEM
    # default at bf16 in/out); otherwise round to the bf16 packing granule (16).
    tm = 1024 if M >= 1024 else _round_up(M, 16)
    grid_m = pl.cdiv(M, tm)  # ragged last block handled by Pallas (masked)

    # im2col: (B, C, nH, P, nW, P) -> (B, nH, nW, C, P, P) -> (M, K); columns
    # flattened in (C, kh, kw) order to match the OIHW Conv2d weight.  Done in
    # compute_dtype so this single XLA layout pass moves half the bytes.
    x_p = x.astype(compute_dtype).reshape(B, C, nH, P, nW, P)
    x_p = jnp.transpose(x_p, (0, 2, 4, 1, 3, 5)).reshape(M, K)

    # Tiny parameter tensors: pad only E to the lane width.
    w_mat = weight.reshape(E, K).T.astype(compute_dtype)           # (K, E)
    w_mat = jnp.pad(w_mat, ((0, 0), (0, E_pad - E)))               # (K, E_pad)
    b_mat = jnp.pad(bias.astype(jnp.float32), (0, E_pad - E)).reshape(1, E_pad)

    csize = np.dtype(compute_dtype).itemsize
    cost = pl.CostEstimate(
        flops=2 * M * K * E_pad,
        transcendentals=0,
        bytes_accessed=(M * K + K * E_pad + M * E_pad) * csize + 4 * E_pad,
    )

    out = pl.pallas_call(
        _patch_embed_kernel,
        out_shape=jax.ShapeDtypeStruct((M, E_pad), compute_dtype),
        grid_spec=pltpu.PrefetchScalarGridSpec(
            num_scalar_prefetch=0,
            grid=(grid_m,),
            in_specs=[
                pl.BlockSpec((tm, K), lambda i: (i, 0)),       # streamed X tiles
                pl.BlockSpec((K, E_pad), lambda i: (0, 0)),    # resident weight
                pl.BlockSpec((1, E_pad), lambda i: (0, 0)),    # resident bias
            ],
            out_specs=pl.BlockSpec((tm, E_pad), lambda i: (i, 0)),
        ),
        compiler_params=pltpu.CompilerParams(
            dimension_semantics=("parallel",)),   # megacore split on v7x
        cost_estimate=cost,
    )(x_p, w_mat, b_mat)

    out = out[:, :E]                                               # (M, E)
    if return_tokens:
        # Transpose-free fast path: (B, num_patches, E) tokens.
        return out.reshape(B, nH * nW, E).astype(out_dtype)

    # Module-parity path: restore the NCHW conv-output layout (cast fuses into
    # this XLA transpose).
    out = out.reshape(B, nH, nW, E).astype(out_dtype)
    return jnp.transpose(out, (0, 3, 1, 2))


if __name__ == "__main__":
    # Small shapes consistent with the module: img_size=16, patch_size=4,
    # in_chans=4, embed_dim=32, batch=2.
    B, C, H, W = 2, 4, 16, 16
    P = 4
    E = 32

    key = jax.random.PRNGKey(0)
    kx, kw, kb = jax.random.split(key, 3)
    x = jax.random.normal(kx, (B, C, H, W), dtype=jnp.float32)
    weight = jax.random.normal(kw, (E, C, P, P), dtype=jnp.float32) * 0.02
    bias = jax.random.normal(kb, (E,), dtype=jnp.float32) * 0.02

    # Default path: NCHW output, matching nn.Conv2d(kernel_size=stride=P).
    y = patch_embed_forward(x, weight, bias, P)
    y = jax.block_until_ready(y)

    y_ref = jax.lax.conv_general_dilated(
        x, weight, window_strides=(P, P), padding="VALID",
        dimension_numbers=("NCHW", "OIHW", "NCHW"),
    ) + bias.reshape(1, E, 1, 1)

    assert y.shape == (B, E, H // P, W // P)
    err = float(jnp.max(jnp.abs(y - y_ref)))
    assert jnp.allclose(y, y_ref, atol=2e-2, rtol=2e-2), err

    # Transpose-free token path (perf fast path) must agree too.
    y_tok = patch_embed_forward(x, weight, bias, P, return_tokens=True)
    y_tok = jax.block_until_ready(y_tok)
    y_tok_ref = jnp.transpose(y_ref, (0, 2, 3, 1)).reshape(B, -1, E)
    assert y_tok.shape == (B, (H // P) * (W // P), E)
    assert jnp.allclose(y_tok, y_tok_ref, atol=2e-2, rtol=2e-2)

    print("KERNEL_OK")
</pallas_src>

<mosaic_0001>
module attributes {stable_mosaic.version = 11 : i64} {
  func.func @_patch_embed_kernel(%arg0: i32, %arg1: memref<32x64xbf16, #tpu.memory_space<vmem>>, %arg2: memref<64x128xbf16, #tpu.memory_space<vmem>>, %arg3: memref<1x128xf32, #tpu.memory_space<vmem>>, %arg4: memref<32x128xbf16, #tpu.memory_space<vmem>>) attributes {dimension_semantics = [#tpu.dimension_semantics<parallel>], iteration_bounds = array<i64: 1>, scalar_prefetch = 0 : i64, scratch_operands = 0 : i64, tpu.core_type = #tpu.core_type<tc>, window_params = [{transform_indices = @transform_0, window_bounds = array<i64: 32, 64>}, {pipeline_mode = #tpu.pipeline_mode<synchronous>, transform_indices = @transform_1, window_bounds = array<i64: 64, 128>}, {pipeline_mode = #tpu.pipeline_mode<synchronous>, transform_indices = @transform_2, window_bounds = array<i64: 1, 128>}, {transform_indices = @transform_3, window_bounds = array<i64: 32, 128>}]} {
    %c0 = arith.constant 0 : index
    %c0_0 = arith.constant 0 : index
    %0 = vector.load %arg1[%c0, %c0_0] : memref<32x64xbf16, #tpu.memory_space<vmem>>, vector<32x64xbf16>
    %c0_1 = arith.constant 0 : index
    %c0_2 = arith.constant 0 : index
    %1 = vector.load %arg2[%c0_1, %c0_2] : memref<64x128xbf16, #tpu.memory_space<vmem>>, vector<64x128xbf16>
    %cst = arith.constant dense<0.000000e+00> : vector<32x128xf32>
    %2 = tpu.matmul %0, %1, %cst {dimension_numbers = #tpu.dot_dimension_numbers<[1], [0], [0], [1], [0, 0, 1, 1], [], []>} : vector<32x64xbf16>, vector<64x128xbf16>, vector<32x128xf32> -> vector<32x128xf32>
    %c0_3 = arith.constant 0 : index
    %c0_4 = arith.constant 0 : index
    %3 = vector.load %arg3[%c0_3, %c0_4] : memref<1x128xf32, #tpu.memory_space<vmem>>, vector<1x128xf32>
    %4 = vector.broadcast %3 : vector<1x128xf32> to vector<32x128xf32>
    %5 = arith.addf %2, %4 : vector<32x128xf32>
    %6 = arith.truncf %5 : vector<32x128xf32> to vector<32x128xbf16>
    %c0_5 = arith.constant 0 : index
    %c0_6 = arith.constant 0 : index
    %7 = vector.load %arg4[%c0_5, %c0_6] : memref<32x128xbf16, #tpu.memory_space<vmem>>, vector<32x128xbf16>
    tpu.vector_store %arg4[%c0_5, %c0_6], %6 {strides = array<i32>} : memref<32x128xbf16, #tpu.memory_space<vmem>>, vector<32x128xbf16>,
    return
  }
  func.func @transform_0(%arg0: i32) -> (i32, i32) {
    %c0_i32 = arith.constant 0 : i32
    %c0_i32_0 = arith.constant 0 : i32
    return %arg0, %c0_i32 : i32, i32
  }
  func.func @transform_1(%arg0: i32) -> (i32, i32) {
    %c0_i32 = arith.constant 0 : i32
    %c0_i32_0 = arith.constant 0 : i32
    %c0_i32_1 = arith.constant 0 : i32
    return %c0_i32, %c0_i32_0 : i32, i32
  }
  func.func @transform_2(%arg0: i32) -> (i32, i32) {
    %c0_i32 = arith.constant 0 : i32
    %c0_i32_0 = arith.constant 0 : i32
    %c0_i32_1 = arith.constant 0 : i32
    return %c0_i32, %c0_i32_0 : i32, i32
  }
  func.func @transform_3(%arg0: i32) -> (i32, i32) {
    %c0_i32 = arith.constant 0 : i32
    %c0_i32_0 = arith.constant 0 : i32
    return %arg0, %c0_i32 : i32, i32
  }
}

</mosaic_0001>

<bundles_post_ra>
// kernel: tpu_custom_call.1
= control target key start
LH: loop header
LB: loop body
LE: loop exit
PB: predicated region body
PF: predicated region fallthrough
CT: control target
= control target key end

     0   :  { %8 = vsyncpa [#allocation3], 0  ;;  %s360_s0 = inlined_call_operand.hbm [shape: bf16[32,64], index: 0, kind: input, shape index: {}]   ;;  %s361_s1 = inlined_call_operand.hbm [shape: bf16[64,128], index: 1, kind: input, shape index: {}]   ;;  %s362_s2 = inlined_call_operand.vmem [shape: f32[1,128], index: 2, kind: input, shape index: {}]   ;;  %s363_s3 = inlined_call_operand.hbm [shape: bf16[32,128], index: 3, kind: output, shape index: {}]  }
   0x1   :  { %9 = vsyncpa [#allocation6], 0 }
   0x2   :  { %10 = vsyncpa [#allocation4], 0  ;;  %s314_s12 = smov [#allocation2]  }
   0x3   :  { %s16_s13 = sshll.u32 %s314_s12, 4  ;;  %s17_s13 = int_to_ptr.vmem [resolvable:$true] %s16_s13 }
   0x4   :  { %s256_s14 = scalar_lea.vmem %s17_s13, 256  ;;  %p261_p1 = scmp.lt.s32.totalorder %s17_s13, %s17_s13 }
   0x5   :  { %p257_p0 = scmp.ne.s32.totalorder %s17_s13, %s256_s14  ;;  %p262_p2 = scmp.lt.s32.totalorder %s256_s14, %s256_s14 }
   0x7   :  { %p263_p3 = por %p262_p2, %p261_p1 }
   0x9   :  { %p264_p4 = pnand %p263_p3, %p257_p0 }
   0xb   :  { %267 = shalt.err (!%p264_p4)
}
   0xc   :  { %s315_s15 = smov 64   ;;  %s316_s16 = smov 4  }
   0xd   :  { %22 = dma.hbm_to_vmem [thread:$0]  %s360_s0, 256, %s17_s13, [#allocation3], %s315_s15, %s315_s15, %s316_s16  }
   0xe   :  { %s317_s19 = smov [#allocation5]  }
   0xf   :  { %s28_s20 = sshll.u32 %s317_s19, 4  ;;  %s29_s20 = int_to_ptr.vmem [resolvable:$true] %s28_s20 }
  0x10   :  { %s276_s21 = scalar_lea.vmem %s29_s20, 512  ;;  %p281_p6 = scmp.lt.s32.totalorder %s29_s20, %s29_s20 }
  0x11   :  { %p277_p5 = scmp.ne.s32.totalorder %s29_s20, %s276_s21  ;;  %p282_p7 = scmp.lt.s32.totalorder %s276_s21, %s276_s21 }
  0x13   :  { %p283_p8 = por %p282_p7, %p281_p6 }
  0x15   :  { %p284_p9 = pnand %p283_p8, %p277_p5 }
  0x17   :  { %287 = shalt.err (!%p284_p9)
}
  0x18   :  { %34 = dma.hbm_to_vmem [thread:$0]  %s361_s1, 512, %s29_s20, [#allocation6], %s315_s15, %s315_s15, %s316_s16  }
  0x19   :  { %308 = dma.done.wait [#allocation3], 256  }
  0x1a   :  { %309 = vsyncadd [#allocation3], 4294967040 }
  0x1b   :  { %310 = dma.done.wait [#allocation6], 512  }
  0x1c   :  { %311 = vsyncadd [#allocation6], 4294966784  ;;  %v242_v0 = vld [vmem:[#allocation5 + $0x18] sm:$0xff]   ;;  %v243_v1 = vld [vmem:[#allocation5 + $0x10] sm:$0xff]   ;;  %vm97_vm0 = vcmask 523264   ;;  %s318_s24 = smov [#allocation7]  }
  0x1d   :  { %225 = vmatprep.subr.bf16.mxu0 %v242_v0  ;;  %v244_v2 = vld [vmem:[#allocation5 + $0x8] sm:$0xff]   ;;  %v246_v3 = vld [vmem:[#allocation2] sm:$0xff]   ;;  %v245_v4 = vld [vmem:[#allocation5] sm:$0xff]   ;;  %s178_s25 = sshll.u32 %s318_s24, 4  ;;  %s179_s25 = int_to_ptr.vmem [resolvable:$true] %s178_s25 }
  0x1e   :  { %226 = vmatpush3.bf16.msra.mxu0 %v242_v0  ;;  %233 = vmatprep.mubr.msk.bf16.mxu0 %vm97_vm0, %v246_v3  ;;  %v247_v5 = vld [vmem:[#allocation2 + $0x8] sm:$0xff]   ;;  %v191_v7 = vld [vmem:[%s362_s2] ss:$0 sm:$0xff]  ;;  %s288_s26 = scalar_lea.vmem %s179_s25, 256  ;;  %p293_p11 = scmp.lt.s32.totalorder %s179_s25, %s179_s25 }
  0x1f   :  { %227 = vmatprep.subr.bf16.mxu0 %v243_v1  ;;  %p289_p10 = scmp.ne.s32.totalorder %s179_s25, %s288_s26  ;;  %p294_p12 = scmp.lt.s32.totalorder %s288_s26, %s288_s26 }
  0x21   :  { %p295_p13 = por %p294_p12, %p293_p11 }
  0x22   :  { %228 = vmatpush3.bf16.msra.mxu0 %v243_v1 }
  0x23   :  { %229 = vmatprep.subr.bf16.mxu0 %v244_v2  ;;  %p296_p0 = pnand %p295_p13, %p289_p10 }
  0x26   :  { %230 = vmatpush3.bf16.msra.mxu0 %v244_v2 }
  0x27   :  { %231 = vmatprep.subr.bf16.mxu0 %v245_v4 }
  0x2a   :  { %232 = vmatpush3.bf16.msra.mxu0 %v245_v4 }
  0x2d   :  { %234 = vmatmul.mubr.msk.bf16.vlgmr.msra.gmra.mxu0 %vm97_vm0, %v247_v5 }
  0xed   :  { %v235_v6 = vpop.f32.mrf.mxu0 }
  0xee   :  { %v147_v10 = vadd.f32 %v235_v6, %v191_v7 }
  0xef   :  { %v138_v8 = vpop.f32.mrf.mxu0 }
  0xf0   :  { %v139_v13 = vadd.f32 %v191_v7, %v138_v8 }
  0xf1   :  { %v236_v9 = vpop.f32.mrf.mxu0 }
  0xf2   :  { %v150_v11 = vadd.f32 %v236_v9, %v191_v7 }
  0xf3   :  { %v141_v12 = vpop.f32.mrf.mxu0 }
  0xf4   :  { %v216_v14 = vpack.c.bf16 %v150_v11, %v147_v10  ;;  %v142_v15 = vadd.f32 %v191_v7, %v141_v12 }
  0xf6   :  { %218 = vst [vmem:[#allocation7 + $0x8] sm:$0xff] %v216_v14   ;;  %v211_v16 = vpack.c.bf16 %v142_v15, %v139_v13 }
  0xf8   :  { %212 = vst [vmem:[#allocation7] sm:$0xff] %v211_v16  }
  0xf9   :  { %299 = shalt.err (!%p296_p0)
}
  0xfa   :  { %184 = dma.vmem_to_hbm [thread:$0]  %s179_s25, 256, %s363_s3, [#allocation4], %s315_s15, %s315_s15, %s316_s16  }
  0xfb   :  { %312 = dma.done.wait [#allocation4], 256  }
  0xfc   :  { %313 = vsyncadd [#allocation4], 4294967040 }
  0xfd   :  { %188 = vsyncpa [#allocation3], 1 }
  0xfe   :  { %189 = vsyncpa [#allocation6], 1 }
  0xff   :  { %190 = vsyncpa [#allocation4], 1 }

</bundles_post_ra>
